<compile_context>
chip_gen: v7x
topology: tpu7x:2x2x1
jax: 0.10.0
libtpu: 0.0.40
codegen_flags: <defaults>
</compile_context>

<pallas_src>
import functools

import jax
import jax.numpy as jnp
from jax import lax
from jax.experimental import pallas as pl
from jax.experimental.pallas import tpu as pltpu


def _round_up(a, b):
    return (a + b - 1) // b * b


def _focal_kernel(x_ref, t_ref, out_ref, *, gamma, ignore_index):
    """One (batch, hw-chunk, hw-tile) grid step.

    x_ref:   (1, C, T)     logits  (classes on sublanes, pixels on lanes)
    t_ref:   (1, 1, T)     int32 targets
    out_ref: (1, 1, 1, T)  f32 lane-dense per-pixel loss accumulator, resident
                           across the innermost 'arbitrary' grid axis.
    """
    j = pl.program_id(2)

    @pl.when(j == 0)
    def _():
        out_ref[...] = jnp.zeros_like(out_ref)

    x = x_ref[0].astype(jnp.float32)              # (C, T)
    t = t_ref[0]                                  # (1, T) int32
    C, T = x.shape

    # NOTE: target values >= C that are not ignore_index produce a finite but
    # meaningless loss here, whereas PyTorch CrossEntropyLoss would error.
    valid = t != ignore_index                     # (1, T) bool

    # Numerically stable log-softmax pieces; class axis = sublanes (XLU).
    # TODO(synk): with C on sublanes, C < 8 leaves sublanes idle on every (C,T)
    # VPU op; accepted as the efficiency floor for this transpose-free layout.
    m = jnp.max(x, axis=0, keepdims=True)         # (1, T)
    e = jnp.exp(x - m)                            # (C, T)  -- the only (C,T) EUP exp
    sum_e = jnp.sum(e, axis=0, keepdims=True)     # (1, T)

    # One-hot gather of the target-class logit along sublanes.
    cls = lax.broadcasted_iota(jnp.int32, (C, T), 0)
    x_t = jnp.sum(jnp.where(cls == t, x, 0.0), axis=0, keepdims=True)   # (1, T)

    # Cross-entropy per pixel; ignored / padded pixels contribute exactly 0.
    logpt = jnp.log(sum_e) + m - x_t              # (1, T)
    logpt = jnp.where(valid, logpt, 0.0)

    # pt = exp(-logpt): single (1,T) exp on the idle EUP slot.  At ignored
    # pixels logpt == 0 -> pt == 1 -> (1 - pt)**gamma * logpt == 0.
    pt = jnp.exp(-logpt)
    one_minus_pt = 1.0 - pt
    if float(gamma) == 2.0:
        w = one_minus_pt * one_minus_pt           # avoid float pow (log+exp EUP pair)
    elif float(gamma).is_integer():
        w = lax.integer_pow(one_minus_pt, int(gamma))
    else:
        w = jnp.power(one_minus_pt, jnp.float32(gamma))

    out_ref[0, 0] = out_ref[0, 0] + w * logpt     # lane-dense elementwise accumulate


def focal_loss(logits_nchw, target_nhw, *, gamma=2.0, alpha=None, ignore_index=255,
               size_average=True, max_tile_hw=65536):
    """Pallas implementation of FocalLoss.forward (alpha=None)."""
    if alpha is not None:
        # TODO(synk): per-class alpha weights (CrossEntropyLoss(weight=alpha)) not implemented.
        raise NotImplementedError("alpha (per-class weights) is not supported")

    N, C, H, W = logits_nchw.shape
    HW = H * W
    M = N * HW

    # NCHW -> (N, C, HW): free reshape, no transpose / extra HBM pass.
    x = logits_nchw.reshape(N, C, HW)
    t = target_nhw.astype(jnp.int32).reshape(N, 1, HW)

    # --- Generation-aware VMEM budget ------------------------------------
    # v7x: 64 MiB/TC -> limit 48 MiB; v5e/v6e: 128 MiB -> limit 96 MiB.
    try:
        vmem_total = int(pltpu.get_tpu_info().vmem_capacity_bytes)
    except Exception:
        vmem_total = 64 * 1024 * 1024             # conservative fallback (v7x per-TC)
    vmem_limit = max(32 * 2**20, min(vmem_total - 16 * 2**20, 96 * 2**20))
    budget = vmem_limit - 8 * 2**20               # headroom below the scoped limit

    in_itemsize = jnp.dtype(x.dtype).itemsize
    # Per-pixel VMEM: double-buffered logits + targets + output blocks, plus
    # ~6 f32 (C, T) temporaries materialized inside the kernel body.
    bytes_per_pixel = 2 * C * in_itemsize + 2 * 4 + 2 * 4 + 6 * C * 4
    cap = max(128, (budget // bytes_per_pixel) // 128 * 128)

    HW128 = _round_up(HW, 128)
    tile_hw = int(min(HW128, min(int(max_tile_hw), cap)))

    # Pad the pixel axis to a multiple of tile_hw: no ragged last tile -> no
    # per-step in-bounds masking and no reliance on OOB block reads.  Padded
    # pixels carry ignore_index so they contribute 0; the mean still divides
    # by the true pixel count M.
    HW_pad = _round_up(HW, tile_hw)
    if HW_pad != HW:
        x = jnp.pad(x, ((0, 0), (0, 0), (0, HW_pad - HW)))
        t = jnp.pad(t, ((0, 0), (0, 0), (0, HW_pad - HW)),
                    constant_values=ignore_index)

    n_hw = HW_pad // tile_hw
    # Split HW tiles into P 'parallel' chunks x n_inner 'arbitrary' steps so
    # v7x megacore has work for both TensorCores even when N is 1-2.
    P = 2 if (n_hw % 2 == 0 and n_hw >= 2) else 1
    n_inner = n_hw // P

    kern = functools.partial(_focal_kernel, gamma=float(gamma),
                             ignore_index=int(ignore_index))

    def x_map(n, p, j, n_inner=n_inner):
        return (n, 0, p * n_inner + j)

    def t_map(n, p, j, n_inner=n_inner):
        return (n, 0, p * n_inner + j)

    def o_map(n, p, j):
        return (n, p, 0, 0)

    partials = pl.pallas_call(
        kern,
        out_shape=jax.ShapeDtypeStruct((N, P, 1, tile_hw), jnp.float32),
        grid_spec=pltpu.PrefetchScalarGridSpec(
            num_scalar_prefetch=0,
            grid=(N, P, n_inner),
            in_specs=[
                pl.BlockSpec((1, C, tile_hw), x_map),
                pl.BlockSpec((1, 1, tile_hw), t_map),
            ],
            out_specs=pl.BlockSpec((1, 1, 1, tile_hw), o_map),
        ),
        compiler_params=pltpu.CompilerParams(
            dimension_semantics=("parallel", "parallel", "arbitrary"),
            vmem_limit_bytes=int(vmem_limit),
        ),
    )(x, t)

    total = jnp.sum(partials, dtype=jnp.float32)
    if size_average:
        # PyTorch loss.mean() divides by ALL pixels (ignored ones included, as zeros).
        return total / jnp.float32(M)
    return total


def _reference_focal_loss(logits_nchw, target_nhw, gamma=2.0, ignore_index=255,
                          size_average=True):
    """Pure-JAX reference for a sanity check."""
    N, C, H, W = logits_nchw.shape
    x = jnp.transpose(logits_nchw, (0, 2, 3, 1)).reshape(-1, C).astype(jnp.float32)
    t = target_nhw.reshape(-1).astype(jnp.int32)
    logp = jax.nn.log_softmax(x, axis=-1)
    safe_t = jnp.where(t == ignore_index, 0, t)
    logpt = -jnp.take_along_axis(logp, safe_t[:, None], axis=-1)[:, 0]
    logpt = jnp.where(t == ignore_index, 0.0, logpt)
    pt = jnp.exp(-logpt)
    loss = (1.0 - pt) ** gamma * logpt
    return loss.mean() if size_average else loss.sum()


if __name__ == "__main__":
    key = jax.random.PRNGKey(0)
    k1, k2, k3 = jax.random.split(key, 3)

    N, C, H, W = 2, 4, 16, 16
    logits = jax.random.normal(k1, (N, C, H, W), dtype=jnp.float32)
    target = jax.random.randint(k2, (N, H, W), 0, C).astype(jnp.int32)
    # sprinkle some ignore_index=255 pixels to exercise masking
    ignore_mask = jax.random.uniform(k3, (N, H, W)) < 0.1
    target = jnp.where(ignore_mask, 255, target)

    out = focal_loss(logits, target, gamma=2.0, ignore_index=255, size_average=True)
    out = jax.block_until_ready(out)

    ref = _reference_focal_loss(logits, target)
    assert jnp.allclose(out, ref, atol=1e-5, rtol=1e-5), (out, ref)

    print("KERNEL_OK")
</pallas_src>

<mosaic_0001>
module attributes {stable_mosaic.version = 11 : i64} {
  func.func @_focal_kernel(%arg0: i32, %arg1: i32, %arg2: i32, %arg3: memref<1x4x256xf32, #tpu.memory_space<vmem>>, %arg4: memref<1x1x256xi32, #tpu.memory_space<vmem>>, %arg5: memref<1x1x1x256xf32, #tpu.memory_space<vmem>>) attributes {dimension_semantics = [#tpu.dimension_semantics<parallel>, #tpu.dimension_semantics<parallel>, #tpu.dimension_semantics<arbitrary>], iteration_bounds = array<i64: 2, 1, 1>, scalar_prefetch = 0 : i64, scratch_operands = 0 : i64, tpu.core_type = #tpu.core_type<tc>, window_params = [{transform_indices = @transform_0, window_bounds = array<i64: 1, 4, 256>}, {transform_indices = @transform_1, window_bounds = array<i64: 1, 1, 256>}, {transform_indices = @transform_2, window_bounds = array<i64: 1, 1, 1, 256>}]} {
    %c0_i32 = arith.constant 0 : i32
    %0 = arith.cmpi eq, %arg2, %c0_i32 : i32
    %1 = arith.extui %0 : i1 to i32
    %c0_i32_0 = arith.constant 0 : i32
    %2 = arith.cmpi ne, %1, %c0_i32_0 : i32
    scf.if %2 {
      %cst_20 = arith.constant 0.000000e+00 : f32
      %41 = vector.broadcast %cst_20 : f32 to vector<1x1x1x256xf32>
      %c0_21 = arith.constant 0 : index
      %c0_22 = arith.constant 0 : index
      %c0_23 = arith.constant 0 : index
      %c0_24 = arith.constant 0 : index
      %42 = vector.load %arg5[%c0_21, %c0_22, %c0_23, %c0_24] : memref<1x1x1x256xf32, #tpu.memory_space<vmem>>, vector<1x1x1x256xf32>
      tpu.vector_store %arg5[%c0_21, %c0_22, %c0_23, %c0_24], %41 {strides = array<i32>} : memref<1x1x1x256xf32, #tpu.memory_space<vmem>>, vector<1x1x1x256xf32>,
    } else {
    }
    %c0 = arith.constant 0 : index
    %c0_1 = arith.constant 0 : index
    %c0_2 = arith.constant 0 : index
    %3 = vector.load %arg3[%c0, %c0_1, %c0_2] : memref<1x4x256xf32, #tpu.memory_space<vmem>>, vector<1x4x256xf32>
    %4 = vector.shape_cast %3 : vector<1x4x256xf32> to vector<4x256xf32>
    %c0_3 = arith.constant 0 : index
    %c0_4 = arith.constant 0 : index
    %c0_5 = arith.constant 0 : index
    %5 = vector.load %arg4[%c0_3, %c0_4, %c0_5] : memref<1x1x256xi32, #tpu.memory_space<vmem>>, vector<1x1x256xi32>
    %6 = vector.shape_cast %5 : vector<1x1x256xi32> to vector<1x256xi32>
    %c255_i32 = arith.constant 255 : i32
    %7 = vector.broadcast %c255_i32 : i32 to vector<1x256xi32>
    %8 = arith.cmpi ne, %6, %7 : vector<1x256xi32>
    %cst = arith.constant dense<0xFF800000> : vector<256xf32>
    %9 = vector.multi_reduction <maximumf>, %4, %cst [0] : vector<4x256xf32> to vector<256xf32>
    %10 = vector.shape_cast %9 : vector<256xf32> to vector<1x256xf32>
    %11 = vector.broadcast %10 : vector<1x256xf32> to vector<4x256xf32>
    %12 = arith.subf %4, %11 : vector<4x256xf32>
    %13 = math.exp %12 : vector<4x256xf32>
    %cst_6 = arith.constant dense<0.000000e+00> : vector<256xf32>
    %14 = vector.multi_reduction <add>, %13, %cst_6 [0] : vector<4x256xf32> to vector<256xf32>
    %15 = vector.shape_cast %14 : vector<256xf32> to vector<1x256xf32>
    %16 = tpu.iota {dimensions = array<i32: 0>} : vector<4x256xi32>
    %17 = vector.broadcast %6 : vector<1x256xi32> to vector<4x256xi32>
    %18 = arith.cmpi eq, %16, %17 : vector<4x256xi32>
    %cst_7 = arith.constant 0.000000e+00 : f32
    %19 = vector.broadcast %cst_7 : f32 to vector<4x256xf32>
    %20 = arith.select %18, %4, %19 : vector<4x256xi1>, vector<4x256xf32>
    %cst_8 = arith.constant dense<0.000000e+00> : vector<256xf32>
    %21 = vector.multi_reduction <add>, %20, %cst_8 [0] : vector<4x256xf32> to vector<256xf32>
    %22 = vector.shape_cast %21 : vector<256xf32> to vector<1x256xf32>
    %23 = math.log %15 : vector<1x256xf32>
    %24 = arith.addf %23, %10 : vector<1x256xf32>
    %25 = arith.subf %24, %22 : vector<1x256xf32>
    %cst_9 = arith.constant 0.000000e+00 : f32
    %26 = vector.broadcast %cst_9 : f32 to vector<1x256xf32>
    %27 = arith.select %8, %25, %26 : vector<1x256xi1>, vector<1x256xf32>
    %cst_10 = arith.constant 0.000000e+00 : f32
    %28 = vector.broadcast %cst_10 : f32 to vector<1x256xf32>
    %29 = arith.subf %28, %27 : vector<1x256xf32>
    %30 = math.exp %29 : vector<1x256xf32>
    %cst_11 = arith.constant 1.000000e+00 : f32
    %31 = vector.broadcast %cst_11 : f32 to vector<1x256xf32>
    %32 = arith.subf %31, %30 : vector<1x256xf32>
    %33 = arith.mulf %32, %32 : vector<1x256xf32>
    %c0_12 = arith.constant 0 : index
    %c0_13 = arith.constant 0 : index
    %c0_14 = arith.constant 0 : index
    %c0_15 = arith.constant 0 : index
    %34 = vector.load %arg5[%c0_12, %c0_13, %c0_14, %c0_15] : memref<1x1x1x256xf32, #tpu.memory_space<vmem>>, vector<1x1x1x256xf32>
    %35 = vector.shape_cast %34 : vector<1x1x1x256xf32> to vector<1x256xf32>
    %36 = arith.mulf %33, %27 : vector<1x256xf32>
    %37 = arith.addf %35, %36 : vector<1x256xf32>
    %c0_16 = arith.constant 0 : index
    %c0_17 = arith.constant 0 : index
    %c0_18 = arith.constant 0 : index
    %c0_19 = arith.constant 0 : index
    %38 = vector.load %arg5[%c0_16, %c0_17, %c0_18, %c0_19] : memref<1x1x1x256xf32, #tpu.memory_space<vmem>>, vector<1x1x1x256xf32>
    %39 = vector.shape_cast %38 : vector<1x1x1x256xf32> to vector<1x256xf32>
    %40 = vector.shape_cast %37 : vector<1x256xf32> to vector<1x1x1x256xf32>
    tpu.vector_store %arg5[%c0_16, %c0_17, %c0_18, %c0_19], %40 {strides = array<i32>} : memref<1x1x1x256xf32, #tpu.memory_space<vmem>>, vector<1x1x1x256xf32>,
    return
  }
  func.func @transform_0(%arg0: i32, %arg1: i32, %arg2: i32) -> (i32, i32, i32) {
    %c1_i32 = arith.constant 1 : i32
    %0 = arith.muli %arg1, %c1_i32 : i32
    %1 = arith.addi %0, %arg2 : i32
    %c0_i32 = arith.constant 0 : i32
    %c0_i32_0 = arith.constant 0 : i32
    return %arg0, %c0_i32, %1 : i32, i32, i32
  }
  func.func @transform_1(%arg0: i32, %arg1: i32, %arg2: i32) -> (i32, i32, i32) {
    %c1_i32 = arith.constant 1 : i32
    %0 = arith.muli %arg1, %c1_i32 : i32
    %1 = arith.addi %0, %arg2 : i32
    %c0_i32 = arith.constant 0 : i32
    %c0_i32_0 = arith.constant 0 : i32
    return %arg0, %c0_i32, %1 : i32, i32, i32
  }
  func.func @transform_2(%arg0: i32, %arg1: i32, %arg2: i32) -> (i32, i32, i32, i32) {
    %c0_i32 = arith.constant 0 : i32
    %c0_i32_0 = arith.constant 0 : i32
    %c0_i32_1 = arith.constant 0 : i32
    return %arg0, %arg1, %c0_i32, %c0_i32_0 : i32, i32, i32, i32
  }
}

</mosaic_0001>

<bundles_post_ra>
// kernel: tpu_custom_call.1
= control target key start
LH: loop header
LB: loop body
LE: loop exit
PB: predicated region body
PF: predicated region fallthrough
CT: control target
= control target key end

     0   :  { %7 = vsyncpa [#allocation3], 0  ;;  %s994_s0 = inlined_call_operand.hbm [shape: f32[2,4,256], index: 0, kind: input, shape index: {}]   ;;  %s995_s1 = inlined_call_operand.hbm [shape: s32[2,1,256], index: 1, kind: input, shape index: {}]   ;;  %s996_s2 = inlined_call_operand.hbm [shape: f32[2,1,1,256], index: 2, kind: output, shape index: {}]  }
   0x1   :  { %9 = vsyncpa [#allocation3 + $0x1], 0 }
   0x2   :  { %10 = vsyncpa [#allocation6], 0 }
   0x3   :  { %12 = vsyncpa [#allocation6 + $0x1], 0 }
   0x4   :  { %13 = vsyncpa [#allocation4], 0 }
   0x5   :  { %15 = vsyncpa [#allocation4 + $0x1], 0  ;;  %s759_s9 = smov 0   ;;  %s761_s10 = smov 0  }
   0x6   :  { %s763_s11 = smov 0   ;;  %s765_s12 = smov 0  }
   0x7   :  { %s767_s13 = smov 0   ;;  %s769_s14 = smov 0  }
   0x8 LB: > { %s491_s15 = sadd.s32 4294967295, %s737_s14   ;;  %s492_s16 = sadd.s32 4294967294, %s737_s14   ;;  %s737_s14 = sphi %s769_s14, %s21_s14   ;;  %s733_s13 = sphi %s767_s13, %s1018_s13   ;;  %s729_s12 = sphi %s765_s12, %s1017_s12   ;;  %s725_s11 = sphi %s763_s11, %s1016_s11   ;;  %s721_s10 = sphi %s761_s10, %s1015_s10   ;;  %s717_s9 = sphi %s759_s9, %s1014_s9  }
   0x9   : > { %s40_s17 = sadd.s32 1, %s733_s13  ;;  %s51_s18 = sadd.s32 1, %s725_s11 }
   0xa   : > { %p42_p0 = scmp.ge.s32.totalorder %s40_s17, 2  ;;  %p58_p1 = scmp.ne.s32.totalorder %s725_s11, %s721_s10 }
   0xb   : > { %p59_p2 = scmp.eq.s32.totalorder %s737_s14, 0  ;;  %p64_p3 = scmp.ne.s32.totalorder %s721_s10, %s717_s9 }
   0xc   : > { %s1020_s17 = smov (%p42_p0, %s40_s17), 0  ;;  %p65_p5 = scmp.eq.s32.totalorder %s491_s15, 0 }
   0xd   : > { %p800_p4 = por %p59_p2, %p58_p1  ;;  %s46_s20 = ssub.s32 %s733_s13, %s1020_s17 }
   0xe   : > { %p120_p6 = scmp.eq.s32.totalorder %s491_s15, 1  ;;  %p49_p7 = scmp.eq.s32.totalorder %s46_s20, 0 }
   0xf   : > { %p806_p8 = por %p65_p5, %p64_p3  ;;  %p126_p10 = scmp.eq.s32.totalorder %s492_s16, 1 }
  0x10   : > { %p810_p9 = por %p120_p6, %p58_p1  ;;  %p530_p13 = scmp.lt.s32.totalorder %s737_s14, 2 }
  0x11   : > { %s1000_s21 = scalar_select %p806_p8, 1, 0 }
  0x12   : > { %s1001_s22 = scalar_select %p810_p9, 1, 0 }
  0x13   : > { %s815_s23 = scalar_select %p49_p7, %s725_s11, %s51_s18  }
  0x14   : > { %p817_p11 = por %p126_p10, %p64_p3  ;;  %s824_s25 = sand.u32 1, %s725_s11  }
  0x15   : > { %s495_s26 = sshll.u32 %s824_s25, 3  ;;  %s510_s27 = sshll.u32 %s733_s13, 7 }
  0x16   : > { %s1002_s24 = scalar_select %p817_p11, 1, 0 }
  0x17   : > { %s831_s30 = scalar_lea.hbm %s994_s0, %s510_s27  ;;  %s150_s3 = scalar_lea.vmem [#allocation2], %s495_s26 }
  0x18   : > { %s161_s4 = sshll.u32 %s150_s3, 4  ;;  %p837_p0 = pnand %p530_p13, %p800_p4  ;;  %s833_s4 = int_to_ptr.vmem [resolvable:$true] %s161_s4 }
  0x19   : > { %s147_s6 = scalar_lea.sflag [#allocation3], %s824_s25  ;;  %s591_s7 = scalar_lea.hbm %s831_s30, 128 }
  0x1a   : > { %p592_p3 = scmp.ne.s32.totalorder %s831_s30, %s591_s7  ;;  %p593_p5 = pneg %p837_p0 }
  0x1b   : > { %s596_s16 = scalar_lea.hbm %s994_s0, 256  ;;  %p597_p4 = scmp.lt.u32.totalorder %s831_s30, %s994_s0 }
  0x1c   : > { %p594_p6 = pnand %p593_p5, %p592_p3  ;;  %p598_p10 = scmp.lt.u32.totalorder %s596_s16, %s591_s7 }
  0x1d   : > { %p600_p12 = scmp.lt.u32.totalorder %s591_s7, %s831_s30 }
  0x1e   : > { %p595_p7 = pneg %p594_p6  ;;  %p599_p13 = por %p598_p10, %p597_p4 }
  0x20   : > { %p601_p1 = por %p600_p12, %p599_p13 }
  0x22   : > { %p602_p2 = pnand %p601_p1, %p595_p7 }
  0x24   : > { %605 = shalt.err (!%p602_p2)
}
  0x25   : > { %s606_s20 = scalar_lea.vmem %s833_s4, 128  ;;  %s739_s26 = smov [#allocation2]  }
  0x26   : > { %p607_p3 = scmp.ne.s32.totalorder %s833_s4, %s606_s20  ;;  %s611_s27 = sshll.u32 %s739_s26, 4  ;;  %s612_s27 = int_to_ptr.vmem [resolvable:$false] %s611_s27 }
  0x27   : > { %s613_s28 = scalar_lea.vmem %s612_s27, 256  ;;  %p614_p9 = scmp.lt.s32.totalorder %s833_s4, %s612_s27 }
  0x28   : > { %p609_p6 = pnand %p607_p3, %p593_p5  ;;  %p615_p4 = scmp.lt.s32.totalorder %s613_s28, %s606_s20 }
  0x2a   : > { %p610_p11 = pneg %p609_p6  ;;  %p616_p10 = por %p615_p4, %p614_p9 }
  0x2c   : > { %p617_p12 = pnand %p616_p10, %p610_p11 }
  0x2e   : > { %620 = shalt.err (!%p617_p12)
}
  0x2f   : > { %522 = dma.hbm_to_vmem [thread:$0]  (!%p837_p0), %s831_s30, 128, %s833_s4, %s147_s6  }
  0x30   : > { %p1004_p1 = scmp.lt.s32.totalorder %s737_s14, 3  ;;  %p1005_p2 = scmp.ge.s32.totalorder %s737_s14, 1 }
  0x31   : > { %s498_s3 = sshll.u32 %s824_s25, 1  ;;  %s511_s7 = sshll.u32 %s733_s13, 5 }
  0x32   : > { %p873_p7 = pnand %p1005_p2, %p1004_p1  ;;  %s882_s16 = scalar_lea.hbm %s995_s1, %s511_s7 }
  0x33   : > { %s172_s18 = scalar_lea.vmem [#allocation5], %s498_s3  ;;  %s169_s30 = scalar_lea.sflag [#allocation6], %s824_s25 }
  0x34   : > { %s1006_s29 = scalar_select %p873_p7, 1, 0 }
  0x35   : > { %s183_s19 = sshll.u32 %s172_s18, 4  ;;  %s621_s4 = scalar_lea.hbm %s882_s16, 32  ;;  %s184_s19 = int_to_ptr.vmem [resolvable:$true] %s183_s19 }
  0x36   : > { %p622_p9 = scmp.ne.s32.totalorder %s882_s16, %s621_s4  ;;  %s626_s26 = scalar_lea.hbm %s995_s1, 64 }
  0x37   : > { %p627_p3 = scmp.lt.u32.totalorder %s882_s16, %s995_s1  ;;  %p628_p6 = scmp.lt.u32.totalorder %s626_s26, %s621_s4 }
  0x38   : > { %p624_p11 = pnand %p622_p9, %p593_p5  ;;  %p630_p10 = scmp.lt.u32.totalorder %s621_s4, %s882_s16 }
  0x39   : > { %p629_p4 = por %p628_p6, %p627_p3 }
  0x3a   : > { %p625_p13 = pneg %p624_p11 }
  0x3b   : > { %p631_p12 = por %p630_p10, %p629_p4 }
  0x3d   : > { %p632_p1 = pnand %p631_p12, %p625_p13 }
  0x3f   : > { %635 = shalt.err (!%p632_p1)
}
  0x40   : > { %s636_s25 = scalar_lea.vmem %s184_s19, 32  ;;  %s740_s3 = smov [#allocation5]  }
  0x41   : > { %p637_p2 = scmp.ne.s32.totalorder %s184_s19, %s636_s25  ;;  %s641_s7 = sshll.u32 %s740_s3, 4  ;;  %s642_s7 = int_to_ptr.vmem [resolvable:$false] %s641_s7 }
  0x42   : > { %s643_s8 = scalar_lea.vmem %s642_s7, 64  ;;  %p644_p8 = scmp.lt.s32.totalorder %s184_s19, %s642_s7 }
  0x43   : > { %p639_p9 = pnand %p637_p2, %p593_p5  ;;  %p645_p7 = scmp.lt.s32.totalorder %s643_s8, %s636_s25 }
  0x45   : > { %p640_p11 = pneg %p639_p9  ;;  %p646_p3 = por %p645_p7, %p644_p8 }
  0x47   : > { %p647_p6 = pnand %p646_p3, %p640_p11 }
  0x49   : > { %650 = shalt.err (!%p647_p6)
}
  0x4a   : > { %525 = dma.hbm_to_vmem [thread:$0]  (!%p837_p0), %s882_s16, 32, %s184_s19, %s169_s30  }
  0x4b   : > { %p1007_p13 = scmp.ne.s32.totalorder %s1006_s29, 0 }
  0x4c   : > { %s907_s15 = sand.u32 (!%p1007_p13), 1, %s721_s10   ;;  %p1008_p5 = scmp.ne.s32.totalorder (!%p1007_p13), %s1000_s21, 0 }
  0x4d   : > { %192 = sbr.rel (%p1007_p13) target bundleno = 197 (0xc5), region = 28  ;;  %s502_s18 = sshll.u32 (!%p1007_p13), %s907_s15, 3 }
  0x4e   : > { %s195_s4 = scalar_lea.sflag (!%p1007_p13), [#allocation3], %s907_s15  ;;  %s198_s6 = scalar_lea.vmem (!%p1007_p13), [#allocation2], %s502_s18 }
  0x54   : > { %704 = dma.done.wait (%p1008_p5), %s195_s4, 128  }
  0x55   : > { %706 = vsyncadd (%p1008_p5), %s195_s4, 4294967168  ;;  %s503_s5 = sshll.u32 %s907_s15, 1  ;;  %s204_s29 = scalar_lea.sflag [#allocation6], %s907_s15 }
  0x56   : > { %s207_s16 = scalar_lea.vmem [#allocation5], %s503_s5 }
  0x57   : > { %708 = dma.done.wait (%p1008_p5), %s204_s29, 32  }
  0x58   : > { %710 = vsyncadd (%p1008_p5), %s204_s29, 4294967264  ;;  %v241_v0 = vlaneseq  ;;  %s925_s19 = scalar_lea.vmem [#allocation7], %s503_s5  ;;  %v741_v2 = vmov 0.0   ;;  %vm252_vm1 = vcmask 1043456   ;;  %v246_v3 = vld [vmem:[%s198_s6] sm:$0xff]  ;;  %s512_s21 = sshll.u32 %s729_s12, 5 }
  0x59   : > { %v250_v4 = vcombine.high %v246_v3, %v246_v3  ;;  %v253_v5 = vsel %vm252_vm1, %v246_v3, -inf  ;;  %v247_v24 = vld [vmem:[%s207_s16] sm:$0x3]  ;;  %v742_v58 = vmov 1966171168   ;;  %s376_s30 = sshll.u32 %s925_s19, 4  ;;  %s942_s27 = scalar_lea.hbm %s996_s2, %s512_s21  ;;  %s944_s30 = int_to_ptr.vmem [resolvable:$true] %s376_s30 }
  0x5a   : > { %vm921_vm0 = vcmp.lt.s32.totalorder %v241_v0, 256  ;;  %v254_v6 = vrot.slane %v253_v5, 4  ;;  %v292_v20 = vshrl.u32 %v241_v0, 7  ;;  %v331_v59 = vunpack.c.l.s4 %v742_v58  ;;  %s360_s28 = scalar_lea.sflag [#allocation4], %s907_s15  ;;  %s651_s25 = scalar_lea.vmem %s944_s30, 32 }
  0x5b   : > { %245 = vst.msk [vmem:[%s925_s19] sm:$0x3] %vm921_vm0, %v741_v2  ;;  %v260_v7 = vsel %vm252_vm1, %v250_v4, -inf  ;;  %vm248_vm4 = vcmp.ne.s32.totalorder %v247_v24, 255  ;;  %p652_p8 = scmp.ne.s32.totalorder %s944_s30, %s651_s25  ;;  %p1011_p0 = scmp.ne.s32.totalorder %s1001_s22, 0 }
  0x5c   : > { %v255_v8 = vmax.f32 %v253_v5, %v254_v6  ;;  %v261_v9 = vrot.slane %v260_v7, 4  ;;  %v295_v23 = vsub.s32 0, %v292_v20  ;;  %v299_v25 = vsub.s32 1, %v292_v20  ;;  %s743_s12 = smov [#allocation7]  }
  0x5d   : > { %p653_p7 = pnand %p652_p8, %p1011_p0  ;;  %s655_s3 = sshll.u32 %s743_s12, 4  ;;  %s656_s3 = int_to_ptr.vmem [resolvable:$false] %s655_s3 }
  0x5e   : > { %v256_v10 = vrot.slane %v255_v8, 2  ;;  %v262_v11 = vmax.f32 %v260_v7, %v261_v9  ;;  %v296_v26 = vrot.slane %v247_v24, %v295_v23  ;;  %v300_v27 = vrot.slane %v247_v24, %v299_v25  ;;  %s657_s7 = scalar_lea.vmem %s656_s3, 64  ;;  %p658_p10 = scmp.lt.s32.totalorder %s944_s30, %s656_s3 }
  0x5f   : > { %p654_p4 = pneg %p653_p7  ;;  %p659_p12 = scmp.lt.s32.totalorder %s657_s7, %s651_s25 }
  0x60   : > { %v257_v12 = vmax.f32 %v255_v8, %v256_v10  ;;  %v263_v13 = vrot.slane %v262_v11, 2  ;;  %vm301_vm2 = vcmp.eq.s32.totalorder %v292_v20, %v296_v26  ;;  %vm302_vm3 = vcmp.eq.s32.totalorder %v292_v20, %v300_v27 }
  0x61   : > { %v303_v28 = vsel %vm301_vm2, %v246_v3, 0.0  ;;  %v304_v32 = vsel %vm302_vm3, %v250_v4, 0.0  ;;  %v332_v4 = vunpack.c.0.s8 %v331_v59  ;;  %p660_p1 = por %p659_p12, %p658_p10 }
  0x62   : > { %v258_v14 = vrot.slane %v257_v12, 1  ;;  %v264_v15 = vmax.f32 %v262_v11, %v263_v13  ;;  %v305_v34 = vsel %vm252_vm1, %v303_v28, 0.0  ;;  %v312_v38 = vsel %vm252_vm1, %v304_v32, 0.0 }
  0x63   : > { %v306_v39 = vrot.slane %v305_v34, 4  ;;  %v313_v42 = vrot.slane %v312_v38, 4  ;;  %v335_v8 = vsub.s32 %v332_v4, %v292_v20  ;;  %p661_p2 = pnand %p660_p1, %p654_p4 }
  0x64   : > { %v259_v16 = vmax.f32 %v257_v12, %v258_v14  ;;  %v265_v17 = vrot.slane %v264_v15, 1 }
  0x65   : > { %v307_v45 = vadd.f32 %v306_v39, %v305_v34  ;;  %v314_v48 = vadd.f32 %v313_v42, %v312_v38 }
  0x66   : > { %v266_v18 = vmax.f32 %v264_v15, %v265_v17 }
  0x67   : > { %v308_v51 = vrot.slane %v307_v45, 2  ;;  %v315_v53 = vrot.slane %v314_v48, 2 }
  0x68   : > { %v269_v19 = vcombine.low %v259_v16, %v266_v18 }
  0x69   : > { %v309_v54 = vadd.f32 %v308_v51, %v307_v45  ;;  %v316_v55 = vadd.f32 %v315_v53, %v314_v48 }
  0x6a   : > { %v271_v21 = vsub.f32 %v246_v3, %v269_v19 }
  0x6b   : > { %v310_v56 = vrot.slane %v309_v54, 1  ;;  %v317_v57 = vrot.slane %v316_v55, 1 }
  0x6c   : > { %v272_v22 = vmul.f32 1.442695, %v271_v21 }
  0x6d   : > { %v311_v61 = vadd.f32 %v310_v56, %v309_v54  ;;  %v318_v0 = vadd.f32 %v317_v57, %v316_v55 }
  0x6e   : > { %583 = vpow2.f32 %v272_v22 }
  0x78   : > { %v584_v29 = vpop.eup %583 }
  0x79   : > { %v275_v30 = vcombine.high %v584_v29, %v584_v29  ;;  %v277_v31 = vsel %vm252_vm1, %v584_v29, 0.0 }
  0x7a   : > { %v278_v33 = vrot.slane %v277_v31, 4 }
  0x7b   : > { %v284_v35 = vsel %vm252_vm1, %v275_v30, 0.0 }
  0x7c   : > { %v279_v36 = vadd.f32 %v278_v33, %v277_v31  ;;  %v285_v37 = vrot.slane %v284_v35, 4 }
  0x7e   : > { %v280_v40 = vrot.slane %v279_v36, 2  ;;  %v286_v41 = vadd.f32 %v285_v37, %v284_v35 }
  0x80   : > { %v281_v43 = vadd.f32 %v280_v40, %v279_v36  ;;  %v287_v44 = vrot.slane %v286_v41, 2 }
  0x82   : > { %v282_v46 = vrot.slane %v281_v43, 1  ;;  %v288_v47 = vadd.f32 %v287_v44, %v286_v41 }
  0x84   : > { %v283_v49 = vadd.f32 %v282_v46, %v281_v43  ;;  %v289_v50 = vrot.slane %v288_v47, 1 }
  0x86   : > { %v290_v52 = vadd.f32 %v289_v50, %v288_v47  ;;  %585 = vlog2.f32 %v283_v49 }
  0x88   : > { %587 = vlog2.f32 %v290_v52 }
  0x90   : > { %v586_v60 = vpop.eup %585 }
  0x91   : > { %v320_v62 = vmul.f32 0.6931472, %v586_v60 }
  0x92   : > { %v588_v63 = vpop.eup %587 }
  0x93   : > { %v322_v2 = vmul.f32 0.6931472, %v588_v63  ;;  %v323_v3 = vadd.f32 %v320_v62, %v259_v16 }
  0x95   : > { %v324_v5 = vadd.f32 %v322_v2, %v266_v18  ;;  %v325_v6 = vsub.f32 %v323_v3, %v311_v61  ;;  %v351_v18 = vld [vmem:[%s925_s19] sm:$0x3] }
  0x97   : > { %v326_v7 = vsub.f32 %v324_v5, %v318_v0 }
  0x99   : > { %v329_v9 = vcombine.low %v325_v6, %v326_v7 }
  0x9b   : > { %v336_v10 = vrot.slane %v329_v9, %v335_v8 }
  0x9d   : > { %v343_v11 = vrot.slane %v336_v10, %v335_v8 }
  0x9f   : > { %v345_v12 = vsel %vm248_vm4, %v343_v11, 0.0 }
  0xa0   : > { %v346_v13 = vsub.f32 0.0, %v345_v12 }
  0xa2   : > { %v347_v14 = vmul.f32 1.442695, %v346_v13 }
  0xa4   : > { %589 = vpow2.f32 %v347_v14 }
  0xae   : > { %v590_v15 = vpop.eup %589 }
  0xaf   : > { %v349_v16 = vsub.f32 1.0, %v590_v15 }
  0xb1   : > { %v350_v17 = vmul.f32 %v349_v16, %v349_v16 }
  0xb3   : > { %v352_v19 = vmul.f32 %v350_v17, %v345_v12 }
  0xb5   : > { %v353_v21 = vadd.f32 %v352_v19, %v351_v18 }
  0xb7   : > { %358 = vst.msk [vmem:[%s925_s19] sm:$0x3] %vm921_vm0, %v353_v21 }
  0xb8   : > { %664 = shalt.err (!%p661_p2)
}
  0xb9   : > { %s665_s8 = scalar_lea.hbm %s942_s27, 32  ;;  %s669_s4 = scalar_lea.hbm %s996_s2, 64 }
  0xba   : > { %p666_p9 = scmp.ne.s32.totalorder %s942_s27, %s665_s8  ;;  %p670_p6 = scmp.lt.u32.totalorder %s942_s27, %s996_s2 }
  0xbb   : > { %p671_p13 = scmp.lt.u32.totalorder %s669_s4, %s665_s8  ;;  %p673_p8 = scmp.lt.u32.totalorder %s665_s8, %s942_s27 }
  0xbc   : > { %p667_p11 = pnand %p666_p9, %p1011_p0 }
  0xbd   : > { %p672_p5 = por %p671_p13, %p670_p6 }
  0xbe   : > { %p668_p3 = pneg %p667_p11 }
  0xbf   : > { %p674_p7 = por %p673_p8, %p672_p5 }
  0xc1   : > { %p675_p4 = pnand %p674_p7, %p668_p3 }
  0xc3   : > { %678 = shalt.err (!%p675_p4)
}
  0xc4   : > { %517 = dma.vmem_to_hbm [thread:$0]  (%p1011_p0), %s944_s30, 32, %s942_s27, %s360_s28  }
  0xc5 PF: > { %s388_s29 = sand.u32 1, %s717_s9   ;;  %p1012_p10 = scmp.ne.s32.totalorder %s1002_s24, 0 }
  0xc6   : > { %p1013_p12 = scmp.ge.s32.totalorder %s737_s14, 2  ;;  %s389_s16 = scalar_lea.sflag [#allocation4], %s388_s29 }
  0xc8   : > { %p527_p1 = pnand %p1013_p12, %p1012_p10 }
  0xca   : > { %712 = dma.done.wait (!%p527_p1), %s389_s16, 32  }
  0xcb   : > { %714 = vsyncadd (!%p527_p1), %s389_s16, 4294967264  ;;  %s21_s14 = sadd.s32 1, %s737_s14   ;;  %s1014_s9 = smov %s721_s10 }
  0xcc   : > { %p18_p2 = scmp.ge.s32.totalorder %s21_s14, 4   ;;  %s1015_s10 = smov %s725_s11 }
  0xcd   : > { %s1016_s11 = smov %s815_s23  ;;  %s1017_s12 = smov %s733_s13 }
  0xce   : > { %s1018_s13 = smov %s1020_s17  ;;  %20 = sbr.rel (!%p18_p2) target bundleno = 8 (0x8), region = 90 }
  0xd5   :  { %394 = vsyncpa [#allocation3], 1 }
  0xd6   :  { %396 = vsyncpa [#allocation3 + $0x1], 1 }
  0xd7   :  { %397 = vsyncpa [#allocation6], 1 }
  0xd8   :  { %399 = vsyncpa [#allocation6 + $0x1], 1 }
  0xd9   :  { %400 = vsyncpa [#allocation4], 1 }
  0xda   :  { %402 = vsyncpa [#allocation4 + $0x1], 1 }

</bundles_post_ra>
